<compile_context>
chip_gen: v7x
topology: tpu7x:2x2x1
jax: 0.10.0
libtpu: 0.0.40
codegen_flags: <defaults>
</compile_context>

<pallas_src>
import functools

import jax
import jax.numpy as jnp
from jax.experimental import pallas as pl
from jax.experimental.pallas import tpu as pltpu


def _round_up(x, m):
    return (x + m - 1) // m * m


# --------------------------------------------------------------------------
# Tiled Pallas matmul (used by every conv via im2col), optional fused ReLU.
# bf16 MXU inputs, f32 accumulation in a VMEM scratch.
# --------------------------------------------------------------------------
def _matmul_kernel(a_ref, b_ref, o_ref, acc_ref, *, relu):
    k = pl.program_id(2)

    @pl.when(k == 0)
    def _init():
        acc_ref[...] = jnp.zeros_like(acc_ref)

    acc_ref[...] += jnp.dot(a_ref[...], b_ref[...],
                            preferred_element_type=jnp.float32)

    @pl.when(k == pl.num_programs(2) - 1)
    def _finalize():
        acc = acc_ref[...]
        if relu:
            acc = jnp.maximum(acc, 0.0)
        o_ref[...] = acc.astype(o_ref.dtype)


def pallas_matmul(a, b, relu=False):
    """a: (M, K) @ b: (K, N) -> (M, N) float32.

    Pads M/N/K internally so every block is (8,128)-aligned and the output store
    is lane-dense (N padded to a multiple of 128); the result is sliced back.
    """
    M, K = a.shape
    K2, N = b.shape
    assert K == K2
    # Tile sizes: 128-aligned in the lane dims, bounded so the double-buffered
    # working set stays ~2 MiB (fits all of v5e/v6e/v7x scoped VMEM comfortably).
    tm = min(256, _round_up(M, 8))
    tn = min(256, _round_up(N, 128))
    tk = min(512, _round_up(K, 128))
    Mp, Np, Kp = _round_up(M, tm), _round_up(N, tn), _round_up(K, tk)

    a_p = a.astype(jnp.bfloat16)
    b_p = b.astype(jnp.bfloat16)
    if (Mp, Kp) != (M, K):
        a_p = jnp.pad(a_p, ((0, Mp - M), (0, Kp - K)))
    if (Kp, Np) != (K, N):
        b_p = jnp.pad(b_p, ((0, Kp - K), (0, Np - N)))

    grid = (Mp // tm, Np // tn, Kp // tk)
    out = pl.pallas_call(
        functools.partial(_matmul_kernel, relu=relu),
        out_shape=jax.ShapeDtypeStruct((Mp, Np), jnp.float32),
        grid=grid,
        in_specs=[
            pl.BlockSpec((tm, tk), lambda i, j, k: (i, k)),
            pl.BlockSpec((tk, tn), lambda i, j, k: (k, j)),
        ],
        out_specs=pl.BlockSpec((tm, tn), lambda i, j, k: (i, j)),
        scratch_shapes=[pltpu.VMEM((tm, tn), jnp.float32)],
        compiler_params=pltpu.CompilerParams(
            dimension_semantics=("parallel", "parallel", "arbitrary"),
            vmem_limit_bytes=32 * 1024 * 1024,
        ),
    )(a_p, b_p)
    if (Mp, Np) != (M, N):
        out = out[:M, :N]
    return out


def conv2d_nhwc(x, w, stride=1, relu=False):
    """kxk conv ('same' padding for odd k, bias=False).

    x: (B, H, W, Cin) NHWC;  w: (Cout, Cin, kh, kw) OIHW (PyTorch layout).
    Lowered to NHWC im2col + tiled Pallas matmul (no activation transposes).
    """
    B, H, W, Cin = x.shape
    Cout, Cin2, kh, kw = w.shape
    assert Cin == Cin2
    patches = jax.lax.conv_general_dilated_patches(
        x, (kh, kw), (stride, stride),
        padding=((kh // 2, kh // 2), (kw // 2, kw // 2)),
        dimension_numbers=("NHWC", "HWIO", "NHWC"),
    )  # (B, OH, OW, Cin*kh*kw); feature order = (Cin major, kh, kw minor)
    _, OH, OW, K = patches.shape
    a = patches.reshape(B * OH * OW, K)
    bmat = w.reshape(Cout, K).T          # (K, Cout), same (Cin, kh, kw) ordering
    out = pallas_matmul(a, bmat, relu=relu)
    return out.reshape(B, OH, OW, Cout)


# --------------------------------------------------------------------------
# SE block (SEBlock.forward): global avg pool -> FC -> ReLU -> FC -> sigmoid
# -> channel-wise rescale.  FC stage is batched over all B rows in one kernel;
# rescale stage is spatially tiled and lane-dense in C.
# --------------------------------------------------------------------------
def _se_scale_kernel(pooled_ref, w1t_ref, w2t_ref, scale_ref):
    p = pooled_ref[...]                                               # (B, C)
    h = jnp.dot(p, w1t_ref[...], preferred_element_type=jnp.float32)  # (B, C//r)
    h = jnp.maximum(h, 0.0)
    s = jnp.dot(h, w2t_ref[...], preferred_element_type=jnp.float32)  # (B, C)
    scale_ref[...] = jax.nn.sigmoid(s)


def _se_rescale_kernel(x_ref, scale_ref, o_ref):
    # x: (1, t_hw, C), scale: (1, 1, C) -> broadcast multiply, lane-dense in C
    o_ref[...] = x_ref[...] * scale_ref[...]


def se_block_nhwc(x, w1t, w2t):
    """x: (B, H, W, C); w1t: (C, C//r), w2t: (C//r, C) (pre-transposed Linear weights)."""
    B, H, W, C = x.shape
    HW = H * W

    # Global average pool: tiny mem-bound reduce, left to XLA.
    pooled = jnp.mean(x.astype(jnp.float32), axis=(1, 2))             # (B, C)

    scale = pl.pallas_call(
        _se_scale_kernel,
        out_shape=jax.ShapeDtypeStruct((B, C), jnp.float32),
        grid=(1,),
        in_specs=[
            pl.BlockSpec((B, C), lambda i: (0, 0)),
            pl.BlockSpec(w1t.shape, lambda i: (0, 0)),
            pl.BlockSpec(w2t.shape, lambda i: (0, 0)),
        ],
        out_specs=pl.BlockSpec((B, C), lambda i: (0, 0)),
    )(pooled, w1t, w2t)

    # Spatial tiling for the rescale (keeps the per-step block bounded at real sizes).
    t_hw = HW
    for cand in (1024, 512, 256, 128, 64, 32, 16, 8):
        if HW % cand == 0:
            t_hw = cand
            break

    xr = x.reshape(B, HW, C)
    scale3 = scale.reshape(B, 1, C)
    out = pl.pallas_call(
        _se_rescale_kernel,
        out_shape=jax.ShapeDtypeStruct((B, HW, C), jnp.float32),
        grid=(B, HW // t_hw),
        in_specs=[
            pl.BlockSpec((1, t_hw, C), lambda b, s: (b, s, 0)),
            pl.BlockSpec((1, 1, C), lambda b, s: (b, 0, 0)),
        ],
        out_specs=pl.BlockSpec((1, t_hw, C), lambda b, s: (b, s, 0)),
        compiler_params=pltpu.CompilerParams(
            dimension_semantics=("parallel", "parallel"),
            vmem_limit_bytes=32 * 1024 * 1024,
        ),
    )(xr, scale3)
    return out.reshape(B, H, W, C)


# --------------------------------------------------------------------------
# Model glue: stand-in encoder/decoder + SE attention on features (NHWC inside).
# --------------------------------------------------------------------------
def upsample2x_nhwc(x):  # nearest-neighbor
    return jnp.repeat(jnp.repeat(x, 2, axis=1), 2, axis=2)


def init_params(key, classes=2, reduction=16):
    chans = [64, 128, 256, 512]
    keys = jax.random.split(key, 32)
    ki = iter(range(32))

    def conv_w(cout, cin, k=3):
        return jax.random.normal(keys[next(ki)], (cout, cin, k, k), jnp.float32) * (
            (cin * k * k) ** -0.5
        )

    def lin_w(out_f, in_f):
        return jax.random.normal(keys[next(ki)], (out_f, in_f), jnp.float32) * (
            in_f ** -0.5
        )

    p = {}
    # stand-in encoder: 4 strided 3x3 convs, channels 3 -> 64 -> 128 -> 256 -> 512
    p["enc1"] = conv_w(64, 3)
    p["enc2"] = conv_w(128, 64)
    p["enc3"] = conv_w(256, 128)
    p["enc4"] = conv_w(512, 256)
    # SE attention weights (SEBlock(ch) for ch in [64, 128, 256, 512]).
    # PyTorch Linear(c, c//r).weight is (c//r, c); we store its transpose so the
    # kernel runs a plain row-major matmul with no in-kernel transpose.
    for i, c in enumerate(chans):
        r = c // reduction
        p[f"se{i}_w1t"] = lin_w(r, c).T   # (c, c//r)
        p[f"se{i}_w2t"] = lin_w(c, r).T   # (c//r, c)
    # stand-in decoder: upsample + skip concat + 3x3 conv
    p["dec3"] = conv_w(256, 512 + 256)
    p["dec2"] = conv_w(128, 256 + 128)
    p["dec1"] = conv_w(64, 128 + 64)
    # segmentation head: 3x3 conv to `classes` (lane-dense padding handled inside
    # pallas_matmul; real classes sliced out after the kernel)
    p["head"] = conv_w(classes, 64)
    return p


def attention_unetpp_forward(x_nchw, p):
    # one layout change per boundary: NCHW (PyTorch) <-> NHWC (TPU lane-dense C)
    x = jnp.transpose(x_nchw, (0, 2, 3, 1))

    # encoder features (channels 64, 128, 256, 512 at decreasing resolution)
    f1 = conv2d_nhwc(x, p["enc1"], stride=2, relu=True)
    f2 = conv2d_nhwc(f1, p["enc2"], stride=2, relu=True)
    f3 = conv2d_nhwc(f2, p["enc3"], stride=2, relu=True)
    f4 = conv2d_nhwc(f3, p["enc4"], stride=2, relu=True)

    # SE attention on each feature map (the AttentionUNetPlusPlus-specific compute)
    f1 = se_block_nhwc(f1, p["se0_w1t"], p["se0_w2t"])
    f2 = se_block_nhwc(f2, p["se1_w1t"], p["se1_w2t"])
    f3 = se_block_nhwc(f3, p["se2_w1t"], p["se2_w2t"])
    f4 = se_block_nhwc(f4, p["se3_w1t"], p["se3_w2t"])

    # decoder
    d3 = conv2d_nhwc(jnp.concatenate([upsample2x_nhwc(f4), f3], axis=3), p["dec3"], relu=True)
    d2 = conv2d_nhwc(jnp.concatenate([upsample2x_nhwc(d3), f2], axis=3), p["dec2"], relu=True)
    d1 = conv2d_nhwc(jnp.concatenate([upsample2x_nhwc(d2), f1], axis=3), p["dec1"], relu=True)

    # segmentation head
    out = conv2d_nhwc(d1, p["head"], relu=False)
    return jnp.transpose(out, (0, 3, 1, 2))


if __name__ == "__main__":
    key = jax.random.PRNGKey(0)
    k_x, k_p = jax.random.split(key)

    # Small self-check: Pallas im2col conv vs XLA native conv (feature-ordering guard).
    xt = jax.random.normal(jax.random.PRNGKey(1), (1, 8, 8, 3), jnp.float32)
    wt = jax.random.normal(jax.random.PRNGKey(2), (8, 3, 3, 3), jnp.float32) * (27.0 ** -0.5)
    got = conv2d_nhwc(xt, wt, stride=1, relu=False)
    ref = jax.lax.conv_general_dilated(
        xt, wt, window_strides=(1, 1), padding=((1, 1), (1, 1)),
        dimension_numbers=("NHWC", "OIHW", "NHWC"),
        precision=jax.lax.Precision.HIGHEST)
    max_err = float(jnp.max(jnp.abs(got - ref)))
    assert max_err < 0.1, max_err  # bf16 MXU inputs, f32 accumulation

    x = jax.random.normal(k_x, (2, 3, 32, 32), jnp.float32)  # NCHW like the PyTorch module
    params = init_params(k_p, classes=2)

    fwd = jax.jit(attention_unetpp_forward)
    out = fwd(x, params)
    out = jax.block_until_ready(out)

    assert out.shape == (2, 2, 16, 16), out.shape
    assert bool(jnp.all(jnp.isfinite(out)))
    print("KERNEL_OK")
</pallas_src>

<mosaic_0001>
module attributes {stable_mosaic.version = 11 : i64} {
  func.func @_matmul_kernel(%arg0: i32, %arg1: i32, %arg2: i32, %arg3: memref<64x128xbf16, #tpu.memory_space<vmem>>, %arg4: memref<128x128xbf16, #tpu.memory_space<vmem>>, %arg5: memref<64x128xf32, #tpu.memory_space<vmem>>, %arg6: memref<64x128xf32, #tpu.memory_space<vmem>>) attributes {dimension_semantics = [#tpu.dimension_semantics<parallel>, #tpu.dimension_semantics<parallel>, #tpu.dimension_semantics<arbitrary>], iteration_bounds = array<i64: 1, 1, 1>, scalar_prefetch = 0 : i64, scratch_operands = 1 : i64, tpu.core_type = #tpu.core_type<tc>, window_params = [{transform_indices = @transform_0, window_bounds = array<i64: 64, 128>}, {transform_indices = @transform_1, window_bounds = array<i64: 128, 128>}, {transform_indices = @transform_2, window_bounds = array<i64: 64, 128>}]} {
    %c0_i32 = arith.constant 0 : i32
    %0 = arith.cmpi eq, %arg2, %c0_i32 : i32
    %1 = arith.extui %0 : i1 to i32
    %c0_i32_0 = arith.constant 0 : i32
    %2 = arith.cmpi ne, %1, %c0_i32_0 : i32
    scf.if %2 {
      %cst_10 = arith.constant 0.000000e+00 : f32
      %12 = vector.broadcast %cst_10 : f32 to vector<64x128xf32>
      %c0_11 = arith.constant 0 : index
      %c0_12 = arith.constant 0 : index
      %13 = vector.load %arg6[%c0_11, %c0_12] : memref<64x128xf32, #tpu.memory_space<vmem>>, vector<64x128xf32>
      tpu.vector_store %arg6[%c0_11, %c0_12], %12 {strides = array<i32>} : memref<64x128xf32, #tpu.memory_space<vmem>>, vector<64x128xf32>,
    } else {
    }
    %c0 = arith.constant 0 : index
    %c0_1 = arith.constant 0 : index
    %3 = vector.load %arg6[%c0, %c0_1] : memref<64x128xf32, #tpu.memory_space<vmem>>, vector<64x128xf32>
    %c0_2 = arith.constant 0 : index
    %c0_3 = arith.constant 0 : index
    %4 = vector.load %arg3[%c0_2, %c0_3] : memref<64x128xbf16, #tpu.memory_space<vmem>>, vector<64x128xbf16>
    %c0_4 = arith.constant 0 : index
    %c0_5 = arith.constant 0 : index
    %5 = vector.load %arg4[%c0_4, %c0_5] : memref<128x128xbf16, #tpu.memory_space<vmem>>, vector<128x128xbf16>
    %cst = arith.constant dense<0.000000e+00> : vector<64x128xf32>
    %6 = tpu.matmul %4, %5, %cst {dimension_numbers = #tpu.dot_dimension_numbers<[1], [0], [0], [1], [0, 0, 1, 1], [], []>} : vector<64x128xbf16>, vector<128x128xbf16>, vector<64x128xf32> -> vector<64x128xf32>
    %7 = arith.addf %3, %6 : vector<64x128xf32>
    %c0_6 = arith.constant 0 : index
    %c0_7 = arith.constant 0 : index
    %8 = vector.load %arg6[%c0_6, %c0_7] : memref<64x128xf32, #tpu.memory_space<vmem>>, vector<64x128xf32>
    tpu.vector_store %arg6[%c0_6, %c0_7], %7 {strides = array<i32>} : memref<64x128xf32, #tpu.memory_space<vmem>>, vector<64x128xf32>,
    %c0_i32_8 = arith.constant 0 : i32
    %9 = arith.cmpi eq, %arg2, %c0_i32_8 : i32
    %10 = arith.extui %9 : i1 to i32
    %c0_i32_9 = arith.constant 0 : i32
    %11 = arith.cmpi ne, %10, %c0_i32_9 : i32
    scf.if %11 {
      %c0_10 = arith.constant 0 : index
      %c0_11 = arith.constant 0 : index
      %12 = vector.load %arg6[%c0_10, %c0_11] : memref<64x128xf32, #tpu.memory_space<vmem>>, vector<64x128xf32>
      %c0_12 = arith.constant 0 : index
      %c0_13 = arith.constant 0 : index
      %13 = vector.load %arg5[%c0_12, %c0_13] : memref<64x128xf32, #tpu.memory_space<vmem>>, vector<64x128xf32>
      tpu.vector_store %arg5[%c0_12, %c0_13], %12 {strides = array<i32>} : memref<64x128xf32, #tpu.memory_space<vmem>>, vector<64x128xf32>,
    } else {
    }
    return
  }
  func.func @transform_0(%arg0: i32, %arg1: i32, %arg2: i32) -> (i32, i32) {
    %c0_i32 = arith.constant 0 : i32
    return %arg0, %arg2 : i32, i32
  }
  func.func @transform_1(%arg0: i32, %arg1: i32, %arg2: i32) -> (i32, i32) {
    %c0_i32 = arith.constant 0 : i32
    return %arg2, %arg1 : i32, i32
  }
  func.func @transform_2(%arg0: i32, %arg1: i32, %arg2: i32) -> (i32, i32) {
    %c0_i32 = arith.constant 0 : i32
    return %arg0, %arg1 : i32, i32
  }
}

</mosaic_0001>

<bundles_post_ra>
// kernel: tpu_custom_call.1
= control target key start
LH: loop header
LB: loop body
LE: loop exit
PB: predicated region body
PF: predicated region fallthrough
CT: control target
= control target key end

     0   :  { %7 = vsyncpa [#allocation4], 0  ;;  %s488_s0 = inlined_call_operand.hbm [shape: bf16[64,128], index: 0, kind: input, shape index: {}]   ;;  %s489_s1 = inlined_call_operand.hbm [shape: bf16[128,128], index: 1, kind: input, shape index: {}]   ;;  %s490_s2 = inlined_call_operand.hbm [shape: f32[64,128], index: 2, kind: output, shape index: {}]  }
   0x1   :  { %8 = vsyncpa [#allocation7], 0 }
   0x2   :  { %9 = vsyncpa [#allocation5], 0  ;;  %s430_s9 = smov [#allocation3]   ;;  %s358_s13 = scalar_lea.hbm %s488_s0, 512 }
   0x3   :  { %s15_s10 = sshll.u32 %s430_s9, 4  ;;  %p359_p0 = scmp.ne.s32.totalorder %s488_s0, %s358_s13  ;;  %s16_s10 = int_to_ptr.vmem [resolvable:$true] %s15_s10 }
   0x4   :  { %p362_p1 = scmp.lt.u32.totalorder %s358_s13, %s488_s0 }
   0x6   :  { %p364_p2 = pnand %p362_p1, %p359_p0 }
   0x8   :  { %367 = shalt.err (!%p364_p2)
}
   0x9   :  { %s368_s18 = scalar_lea.vmem %s16_s10, 512  ;;  %p373_p4 = scmp.lt.s32.totalorder %s16_s10, %s16_s10 }
   0xa   :  { %p369_p3 = scmp.ne.s32.totalorder %s16_s10, %s368_s18  ;;  %p374_p5 = scmp.lt.s32.totalorder %s368_s18, %s368_s18 }
   0xc   :  { %p375_p6 = por %p374_p5, %p373_p4 }
   0xe   :  { %p376_p7 = pnand %p375_p6, %p369_p3 }
  0x10   :  { %379 = shalt.err (!%p376_p7)
}
  0x11   :  { %s431_s19 = smov 64   ;;  %s432_s20 = smov 4  }
  0x12   :  { %21 = dma.hbm_to_vmem [thread:$0]  %s488_s0, 512, %s16_s10, [#allocation4], %s431_s19, %s431_s19, %s432_s20  }
  0x13   :  { %s433_s23 = smov [#allocation6]   ;;  %s380_s27 = scalar_lea.hbm %s489_s1, 1024 }
  0x14   :  { %s27_s24 = sshll.u32 %s433_s23, 4  ;;  %p381_p8 = scmp.ne.s32.totalorder %s489_s1, %s380_s27  ;;  %s28_s24 = int_to_ptr.vmem [resolvable:$true] %s27_s24 }
  0x15   :  { %p384_p9 = scmp.lt.u32.totalorder %s380_s27, %s489_s1 }
  0x17   :  { %p386_p10 = pnand %p384_p9, %p381_p8 }
  0x19   :  { %389 = shalt.err (!%p386_p10)
}
  0x1a   :  { %s390_s4 = scalar_lea.vmem %s28_s24, 1024  ;;  %p395_p12 = scmp.lt.s32.totalorder %s28_s24, %s28_s24 }
  0x1b   :  { %p391_p11 = scmp.ne.s32.totalorder %s28_s24, %s390_s4  ;;  %p396_p13 = scmp.lt.s32.totalorder %s390_s4, %s390_s4 }
  0x1d   :  { %p397_p0 = por %p396_p13, %p395_p12 }
  0x1f   :  { %p398_p1 = pnand %p397_p0, %p391_p11 }
  0x21   :  { %401 = shalt.err (!%p398_p1)
}
  0x22   :  { %33 = dma.hbm_to_vmem [thread:$0]  %s489_s1, 1024, %s28_s24, [#allocation7], %s431_s19, %s431_s19, %s432_s20  }
  0x23   :  { %424 = dma.done.wait [#allocation4], 512  }
  0x24   :  { %425 = vsyncadd [#allocation4], 4294966784 }
  0x25   :  { %426 = dma.done.wait [#allocation7], 1024  }
  0x26   :  { %427 = vsyncadd [#allocation7], 4294966272  ;;  %v346_v0 = vld [vmem:[#allocation6] sm:$0xff]   ;;  %v347_v1 = vld [vmem:[#allocation6 + $0x8] sm:$0xff]   ;;  %s434_s1 = smov [#allocation8]  }
  0x27   :  { %299 = vmatprep.subr.bf16.mxu0 %v346_v0  ;;  %323 = vmatprep.subr.bf16.mxu1 %v346_v0  ;;  %v348_v2 = vld [vmem:[#allocation6 + $0x10] sm:$0xff]   ;;  %v349_v3 = vld [vmem:[#allocation6 + $0x18] sm:$0xff]   ;;  %v354_v4 = vld [vmem:[#allocation3] sm:$0xff]   ;;  %s262_s6 = sshll.u32 %s434_s1, 4  ;;  %s263_s6 = int_to_ptr.vmem [resolvable:$true] %s262_s6 }
  0x28   :  { %300 = vmatpush3.bf16.msra.mxu0 %v346_v0  ;;  %331 = vmatpush3.bf16.msra.mxu1 %v346_v0  ;;  %v355_v5 = vld [vmem:[#allocation3 + $0x10] sm:$0xff]   ;;  %v350_v6 = vld [vmem:[#allocation6 + $0x20] sm:$0xff]   ;;  %v351_v7 = vld [vmem:[#allocation6 + $0x28] sm:$0xff]   ;;  %s402_s7 = scalar_lea.vmem %s263_s6, 1024  ;;  %p407_p3 = scmp.lt.s32.totalorder %s263_s6, %s263_s6 }
  0x29   :  { %301 = vmatprep.subr.bf16.mxu0 %v347_v1  ;;  %324 = vmatprep.subr.bf16.mxu1 %v347_v1  ;;  %v352_v8 = vld [vmem:[#allocation6 + $0x30] sm:$0xff]   ;;  %v353_v9 = vld [vmem:[#allocation6 + $0x38] sm:$0xff]   ;;  %v356_v10 = vld [vmem:[#allocation3 + $0x8] sm:$0xff]   ;;  %p403_p2 = scmp.ne.s32.totalorder %s263_s6, %s402_s7  ;;  %p408_p4 = scmp.lt.s32.totalorder %s402_s7, %s402_s7 }
  0x2a   :  { %315 = vmatprep.mubr.bf16.mxu0 %v354_v4  ;;  %319 = vmatprep.mubr.bf16.mxu1 %v355_v5  ;;  %v357_v11 = vld [vmem:[#allocation3 + $0x18] sm:$0xff]  }
  0x2b   :  { %p409_p5 = por %p408_p4, %p407_p3 }
  0x2c   :  { %302 = vmatpush3.bf16.msra.mxu0 %v347_v1  ;;  %332 = vmatpush3.bf16.msra.mxu1 %v347_v1 }
  0x2d   :  { %303 = vmatprep.subr.bf16.mxu0 %v348_v2  ;;  %325 = vmatprep.subr.bf16.mxu1 %v348_v2  ;;  %p410_p6 = pnand %p409_p5, %p403_p2 }
  0x30   :  { %304 = vmatpush3.bf16.msra.mxu0 %v348_v2  ;;  %333 = vmatpush3.bf16.msra.mxu1 %v348_v2 }
  0x31   :  { %305 = vmatprep.subr.bf16.mxu0 %v349_v3  ;;  %326 = vmatprep.subr.bf16.mxu1 %v349_v3 }
  0x34   :  { %306 = vmatpush3.bf16.msra.mxu0 %v349_v3  ;;  %334 = vmatpush3.bf16.msra.mxu1 %v349_v3 }
  0x35   :  { %307 = vmatprep.subr.bf16.mxu0 %v350_v6  ;;  %327 = vmatprep.subr.bf16.mxu1 %v350_v6 }
  0x38   :  { %308 = vmatpush3.bf16.msra.mxu0 %v350_v6  ;;  %335 = vmatpush3.bf16.msra.mxu1 %v350_v6 }
  0x39   :  { %309 = vmatprep.subr.bf16.mxu0 %v351_v7  ;;  %328 = vmatprep.subr.bf16.mxu1 %v351_v7 }
  0x3c   :  { %310 = vmatpush3.bf16.msra.mxu0 %v351_v7  ;;  %336 = vmatpush3.bf16.msra.mxu1 %v351_v7 }
  0x3d   :  { %311 = vmatprep.subr.bf16.mxu0 %v352_v8  ;;  %329 = vmatprep.subr.bf16.mxu1 %v352_v8 }
  0x40   :  { %312 = vmatpush3.bf16.msra.mxu0 %v352_v8  ;;  %337 = vmatpush3.bf16.msra.mxu1 %v352_v8 }
  0x41   :  { %313 = vmatprep.subr.bf16.mxu0 %v353_v9  ;;  %330 = vmatprep.subr.bf16.mxu1 %v353_v9 }
  0x44   :  { %314 = vmatpush3.bf16.msra.mxu0 %v353_v9  ;;  %338 = vmatpush3.bf16.msra.mxu1 %v353_v9 }
  0x47   :  { %316 = vmatmul.mubr.bf16.vlgmr.msra.gmra.mrb[0].mxu0 %v356_v10  ;;  %320 = vmatmul.mubr.bf16.vlgmr.msra.gmra.mrb[0].mxu1 %v357_v11 }
 0x11a   :  { %v317_v12 = vpop.f32.mrb[0].mxu0  ;;  %v321_v13 = vpop.f32.mrb[0].mxu1 }
 0x11b   :  { %251 = vst [vmem:[#allocation8 + $0x10] sm:$0xff] %v317_v12  ;;  %255 = vst [vmem:[#allocation8 + $0x30] sm:$0xff] %v321_v13  ;;  %v191_v14 = vpop.f32.mrb[1].mxu0  ;;  %v207_v15 = vpop.f32.mrb[1].mxu1 }
 0x11c   :  { %249 = vst [vmem:[#allocation8] sm:$0xff] %v191_v14  ;;  %253 = vst [vmem:[#allocation8 + $0x20] sm:$0xff] %v207_v15  ;;  %v318_v16 = vpop.f32.mrb[2].mxu0  ;;  %v322_v17 = vpop.f32.mrb[2].mxu1 }
 0x11d   :  { %252 = vst [vmem:[#allocation8 + $0x18] sm:$0xff] %v318_v16  ;;  %256 = vst [vmem:[#allocation8 + $0x38] sm:$0xff] %v322_v17  ;;  %v194_v18 = vpop.f32.mrb[3].mxu0  ;;  %v210_v19 = vpop.f32.mrb[3].mxu1 }
 0x11e   :  { %250 = vst [vmem:[#allocation8 + $0x8] sm:$0xff] %v194_v18  ;;  %254 = vst [vmem:[#allocation8 + $0x28] sm:$0xff] %v210_v19 }
 0x11f   :  { %413 = shalt.err (!%p410_p6)
}
 0x120   :  { %s414_s10 = scalar_lea.hbm %s490_s2, 1024 }
 0x121   :  { %p415_p7 = scmp.ne.s32.totalorder %s490_s2, %s414_s10  ;;  %p418_p8 = scmp.lt.u32.totalorder %s414_s10, %s490_s2 }
 0x123   :  { %p420_p9 = pnand %p418_p8, %p415_p7 }
 0x125   :  { %423 = shalt.err (!%p420_p9)
}
 0x126   :  { %s435_s15 = smov 128   ;;  %s436_s16 = smov 8  }
 0x127   :  { %268 = dma.vmem_to_hbm [thread:$0]  %s263_s6, 1024, %s490_s2, [#allocation5], %s435_s15, %s435_s15, %s436_s16  }
 0x128   :  { %428 = dma.done.wait [#allocation5], 1024  }
 0x129   :  { %429 = vsyncadd [#allocation5], 4294966272 }
 0x12a   :  { %272 = vsyncpa [#allocation4], 1 }
 0x12b   :  { %273 = vsyncpa [#allocation7], 1 }
 0x12c   :  { %274 = vsyncpa [#allocation5], 1 }

</bundles_post_ra>
